<compile_context>
chip_gen: v7x
topology: tpu7x:2x2x1
jax: 0.10.0
libtpu: 0.0.40
codegen_flags: <defaults>
</compile_context>

<pallas_src>
import functools

import jax
import jax.numpy as jnp
from jax import lax
from jax.experimental import pallas as pl
from jax.experimental.pallas import tpu as pltpu


def _dropout_train_kernel(seed_ref, x_ref, o_ref, *, threshold16, inv_keep,
                          block_rows):
    """out = keep(hash(global_idx, seed)) ? x * 1/(1-rate) : 0."""
    tb, cols = x_ref.shape                         # static block shape
    scale = jnp.float32(inv_keep)                  # scale applied in f32
    thr = jnp.uint32(threshold16)

    # One 32-bit hash per pair of elements when each half stays >= 128 lanes
    # wide (keeps output stores unmasked); otherwise one hash per element.
    pair_split = (cols % 256 == 0)
    hw = cols // 2 if pair_split else cols

    # Scalar-unit base: per-tile offset and seed mix folded into one scalar.
    tile = pl.program_id(0).astype(jnp.uint32)
    seed = seed_ref[0].astype(jnp.uint32)
    base = tile * jnp.uint32(block_rows * hw) + seed * jnp.uint32(0x9E3779B9)

    # Global (pair) index; hw is a power of two so the multiply is a shift.
    row = lax.broadcasted_iota(jnp.int32, (tb, hw), 0).astype(jnp.uint32)
    col = lax.broadcasted_iota(jnp.int32, (tb, hw), 1).astype(jnp.uint32)
    z = row * jnp.uint32(hw) + col + base

    # lowbias32 finalizer (pure VPU integer ops, good avalanche).
    z = (z ^ (z >> 16)) * jnp.uint32(0x7FEB352D)
    z = (z ^ (z >> 15)) * jnp.uint32(0x846CA68B)
    z = z ^ (z >> 16)

    if pair_split:
        half = cols // 2
        keep_lo = (z & jnp.uint32(0xFFFF)) >= thr   # P(keep) = 1 - rate
        keep_hi = (z >> 16) >= thr
        o_ref[:, :half] = jnp.where(
            keep_lo, x_ref[:, :half] * scale, 0.0).astype(o_ref.dtype)
        o_ref[:, half:] = jnp.where(
            keep_hi, x_ref[:, half:] * scale, 0.0).astype(o_ref.dtype)
    else:
        keep = (z >> 16) >= thr
        o_ref[...] = jnp.where(keep, x_ref[...] * scale, 0.0).astype(o_ref.dtype)


def _tpu_block_params():
    """Generation-aware (target block bytes, scoped VMEM limit)."""
    kind = ""
    try:
        kind = jax.devices()[0].device_kind.lower()
    except Exception:
        pass
    if "v7" in kind:
        # 64 MiB physical VMEM: 2 bufs x (in + out) x 4 MiB = 16 MiB in flight.
        return 4 * 1024 * 1024, 28 * 1024 * 1024
    # v5e / v6e: 128 MiB physical VMEM; 2 x 2 x 8 MiB = 32 MiB in flight.
    return 8 * 1024 * 1024, 64 * 1024 * 1024


def _choose_cols(n):
    """Largest lane-dense column count dividing n that keeps rows >= 8."""
    fallback = None
    for c in (1024, 512, 256, 128):
        if n % c == 0:
            fallback = c          # ends as the smallest dividing candidate
            if n // c >= 8:
                return c
    return fallback               # None -> caller pads


def _choose_block_rows(rows, cols, itemsize, target_bytes):
    """Row-tile: ~target_bytes per block, sublane-packed, >= ~8 grid steps."""
    sub = max(8, 32 // max(1, itemsize))     # 8 f32, 16 bf16, 32 int8/fp8
    if rows <= sub:
        return rows                          # single (full-dim) block
    tb = target_bytes // max(1, cols * itemsize)
    steps = 8 if rows >= 8 * sub else 2      # keep the pipeline / 2 TCs busy
    tb = min(tb, pl.cdiv(rows, steps))
    tb = max(sub, (tb // sub) * sub)
    return tb


def dropout(x, dropout_rate, seed, training=True):
    """Pallas TPU DropoutLayer.forward.

    Args:
      x: array of any shape.
      dropout_rate: python float in [0, 1), probability of dropping a unit.
      seed: int or int32 array; PRNG seed (mask is deterministic per seed).
      training: python bool; identity in eval mode.
    Returns:
      Array with the same shape/dtype as x.
    """
    rate = float(dropout_rate)
    if not training or rate <= 0.0:
        return x                                  # eval / no-op: no kernel
    if rate >= 1.0:                               # guard 1/(1-rate)
        return jnp.zeros_like(x)

    orig_shape = x.shape
    n = x.size
    if n == 0:
        return x

    # Flatten to a lane/sublane-dense (rows, cols) slab.
    flat = x.reshape(-1)
    cols = _choose_cols(n)
    padded = n
    if cols is None:
        cols = 512 if n >= 8 * 512 else 128
        padded = pl.cdiv(n, cols) * cols
        flat = jnp.pad(flat, (0, padded - n))     # tail pad (processed, sliced off)
    rows = padded // cols
    x2 = flat.reshape(rows, cols)

    target_bytes, vmem_limit = _tpu_block_params()
    tb = _choose_block_rows(rows, cols, x2.dtype.itemsize, target_bytes)
    grid = (pl.cdiv(rows, tb),)

    threshold16 = min(int(round(rate * 65536.0)), 65535)
    inv_keep = 1.0 / (1.0 - rate)
    seed_arr = jnp.asarray(seed, dtype=jnp.int32).reshape(1)

    kernel = functools.partial(
        _dropout_train_kernel,
        threshold16=threshold16,
        inv_keep=inv_keep,
        block_rows=tb,
    )

    out = pl.pallas_call(
        kernel,
        out_shape=jax.ShapeDtypeStruct((rows, cols), x2.dtype),
        grid_spec=pltpu.PrefetchScalarGridSpec(
            num_scalar_prefetch=1,                # seed lands in SMEM
            grid=grid,
            in_specs=[pl.BlockSpec((tb, cols), lambda i, seed: (i, 0))],
            out_specs=pl.BlockSpec((tb, cols), lambda i, seed: (i, 0)),
        ),
        compiler_params=pltpu.CompilerParams(
            dimension_semantics=("parallel",),    # tiles are independent
            vmem_limit_bytes=vmem_limit,
        ),
    )(seed_arr, x2)

    out_flat = out.reshape(-1)
    if padded != n:
        out_flat = out_flat[:n]
    return out_flat.reshape(orig_shape)
    # TODO(synk): the PyTorch module also caches self.mask for backward(); the
    # forward kernel is stateless (backward would re-derive the mask from seed).


if __name__ == "__main__":
    key = jax.random.PRNGKey(0)
    rate = 0.5
    seed = jnp.asarray(1234, dtype=jnp.int32)

    # Small MLP-style activation: batch=8, hidden=128.
    x = jax.random.normal(key, (8, 128), dtype=jnp.float32)

    y_train = jax.block_until_ready(dropout(x, rate, seed, training=True))
    y_eval = jax.block_until_ready(dropout(x, rate, seed, training=False))

    # Forward-semantics sanity checks.
    assert y_train.shape == x.shape and y_train.dtype == x.dtype
    assert jnp.allclose(y_eval, x)
    kept_val = x / (1.0 - rate)
    ok = jnp.logical_or(y_train == 0.0,
                        jnp.isclose(y_train, kept_val, rtol=1e-6, atol=1e-6))
    assert bool(jnp.all(ok))
    keep_frac = float(jnp.mean((y_train != 0.0).astype(jnp.float32)))
    assert 0.3 < keep_frac < 0.7, keep_frac
    # Same seed -> same mask (deterministic counter-based PRNG).
    y_train2 = jax.block_until_ready(dropout(x, rate, seed, training=True))
    assert bool(jnp.all(y_train == y_train2))

    # Odd shape exercises the pad-to-lane-dense path.
    x_odd = jax.random.normal(jax.random.PRNGKey(1), (3, 50), dtype=jnp.float32)
    y_odd = jax.block_until_ready(dropout(x_odd, rate, seed, training=True))
    assert y_odd.shape == x_odd.shape
    ok_odd = jnp.logical_or(
        y_odd == 0.0,
        jnp.isclose(y_odd, x_odd / (1.0 - rate), rtol=1e-6, atol=1e-6))
    assert bool(jnp.all(ok_odd))

    # bf16 path (scale applied in f32, cast at the store).
    x_bf = x.astype(jnp.bfloat16)
    y_bf = jax.block_until_ready(dropout(x_bf, rate, seed, training=True))
    assert y_bf.shape == x_bf.shape and y_bf.dtype == jnp.bfloat16

    print("KERNEL_OK")
</pallas_src>

<mosaic_0001>
module attributes {stable_mosaic.version = 11 : i64} {
  func.func @_dropout_train_kernel(%arg0: i32, %arg1: memref<1xi32, #tpu.memory_space<smem>>, %arg2: memref<8x128xf32, #tpu.memory_space<vmem>>, %arg3: memref<8x128xf32, #tpu.memory_space<vmem>>) attributes {dimension_semantics = [#tpu.dimension_semantics<parallel>], iteration_bounds = array<i64: 1>, scalar_prefetch = 1 : i64, scratch_operands = 0 : i64, tpu.core_type = #tpu.core_type<tc>, window_params = [{transform_indices = @transform_0, window_bounds = array<i64: 8, 128>}, {transform_indices = @transform_1, window_bounds = array<i64: 8, 128>}]} {
    %c0 = arith.constant 0 : index
    %0 = memref.load %arg1[%c0] : memref<1xi32, #tpu.memory_space<smem>>
    %c1024_i32 = arith.constant 1024 : i32
    %1 = arith.muli %arg0, %c1024_i32 : i32
    %c-1640531527_i32 = arith.constant -1640531527 : i32
    %2 = arith.muli %0, %c-1640531527_i32 : i32
    %3 = arith.addi %1, %2 : i32
    %4 = tpu.iota {dimensions = array<i32: 0>} : vector<8x128xi32>
    %5 = tpu.iota {dimensions = array<i32: 1>} : vector<8x128xi32>
    %c128_i32 = arith.constant 128 : i32
    %6 = vector.broadcast %c128_i32 : i32 to vector<8x128xi32>
    %7 = arith.muli %4, %6 : vector<8x128xi32>
    %8 = arith.addi %7, %5 : vector<8x128xi32>
    %9 = vector.broadcast %3 : i32 to vector<8x128xi32>
    %10 = arith.addi %8, %9 : vector<8x128xi32>
    %c16_i32 = arith.constant 16 : i32
    %11 = vector.broadcast %c16_i32 : i32 to vector<8x128xi32>
    %12 = arith.shrui %10, %11 : vector<8x128xi32>
    %13 = arith.xori %10, %12 : vector<8x128xi32>
    %c2146121005_i32 = arith.constant 2146121005 : i32
    %14 = vector.broadcast %c2146121005_i32 : i32 to vector<8x128xi32>
    %15 = arith.muli %13, %14 : vector<8x128xi32>
    %c15_i32 = arith.constant 15 : i32
    %16 = vector.broadcast %c15_i32 : i32 to vector<8x128xi32>
    %17 = arith.shrui %15, %16 : vector<8x128xi32>
    %18 = arith.xori %15, %17 : vector<8x128xi32>
    %c-2073254261_i32 = arith.constant -2073254261 : i32
    %19 = vector.broadcast %c-2073254261_i32 : i32 to vector<8x128xi32>
    %20 = arith.muli %18, %19 : vector<8x128xi32>
    %c16_i32_0 = arith.constant 16 : i32
    %21 = vector.broadcast %c16_i32_0 : i32 to vector<8x128xi32>
    %22 = arith.shrui %20, %21 : vector<8x128xi32>
    %23 = arith.xori %20, %22 : vector<8x128xi32>
    %c16_i32_1 = arith.constant 16 : i32
    %24 = vector.broadcast %c16_i32_1 : i32 to vector<8x128xi32>
    %25 = arith.shrui %23, %24 : vector<8x128xi32>
    %c32768_i32 = arith.constant 32768 : i32
    %26 = vector.broadcast %c32768_i32 : i32 to vector<8x128xi32>
    %27 = arith.cmpi uge, %25, %26 : vector<8x128xi32>
    %c0_2 = arith.constant 0 : index
    %c0_3 = arith.constant 0 : index
    %28 = vector.load %arg2[%c0_2, %c0_3] : memref<8x128xf32, #tpu.memory_space<vmem>>, vector<8x128xf32>
    %cst = arith.constant 2.000000e+00 : f32
    %29 = vector.broadcast %cst : f32 to vector<8x128xf32>
    %30 = arith.mulf %28, %29 : vector<8x128xf32>
    %cst_4 = arith.constant 0.000000e+00 : f32
    %31 = vector.broadcast %cst_4 : f32 to vector<8x128xf32>
    %32 = arith.select %27, %30, %31 : vector<8x128xi1>, vector<8x128xf32>
    %c0_5 = arith.constant 0 : index
    %c0_6 = arith.constant 0 : index
    %33 = vector.load %arg3[%c0_5, %c0_6] : memref<8x128xf32, #tpu.memory_space<vmem>>, vector<8x128xf32>
    tpu.vector_store %arg3[%c0_5, %c0_6], %32 {strides = array<i32>} : memref<8x128xf32, #tpu.memory_space<vmem>>, vector<8x128xf32>,
    return
  }
  func.func @transform_0(%arg0: i32, %arg1: memref<1xi32, #tpu.memory_space<smem>>) -> (i32, i32) {
    %c0_i32 = arith.constant 0 : i32
    %c0_i32_0 = arith.constant 0 : i32
    return %arg0, %c0_i32 : i32, i32
  }
  func.func @transform_1(%arg0: i32, %arg1: memref<1xi32, #tpu.memory_space<smem>>) -> (i32, i32) {
    %c0_i32 = arith.constant 0 : i32
    %c0_i32_0 = arith.constant 0 : i32
    return %arg0, %c0_i32 : i32, i32
  }
}

</mosaic_0001>

<bundles_post_ra>
// kernel: tpu_custom_call.1
= control target key start
LH: loop header
LB: loop body
LE: loop exit
PB: predicated region body
PF: predicated region fallthrough
CT: control target
= control target key end

     0   :  { %8 = vsyncpa [#allocation5], 0  ;;  %s158_s0 = inlined_call_operand.<no memory space> [shape: s32[1], index: 0, kind: input, shape index: {}]   ;;  %s159_s1 = inlined_call_operand.hbm [shape: f32[8,128], index: 1, kind: input, shape index: {}]   ;;  %s160_s2 = inlined_call_operand.hbm [shape: f32[8,128], index: 2, kind: output, shape index: {}]  }
   0x1   :  { %9 = vsyncpa [#allocation6], 0  ;;  %s114_s9 = smov [#allocation4]   ;;  %s66_s13 = scalar_lea.hbm %s159_s1, 128 }
   0x2   :  { %s16_s10 = sshll.u32 %s114_s9, 4  ;;  %p67_p0 = scmp.ne.s32.totalorder %s159_s1, %s66_s13  ;;  %s17_s10 = int_to_ptr.vmem [resolvable:$true] %s16_s10 }
   0x3   :  { %p70_p1 = scmp.lt.u32.totalorder %s66_s13, %s159_s1 }
   0x5   :  { %p72_p2 = pnand %p70_p1, %p67_p0 }
   0x7   :  { %75 = shalt.err (!%p72_p2)
}
   0x8   :  { %s76_s18 = scalar_lea.vmem %s17_s10, 128  ;;  %p81_p4 = scmp.lt.s32.totalorder %s17_s10, %s17_s10 }
   0x9   :  { %p77_p3 = scmp.ne.s32.totalorder %s17_s10, %s76_s18  ;;  %p82_p5 = scmp.lt.s32.totalorder %s76_s18, %s76_s18 }
   0xb   :  { %p83_p6 = por %p82_p5, %p81_p4 }
   0xd   :  { %p84_p7 = pnand %p83_p6, %p77_p3 }
   0xf   :  { %87 = shalt.err (!%p84_p7)
}
  0x10   :  { %19 = dma.hbm_to_vmem [thread:$0]  %s159_s1, 128, %s17_s10, [#allocation5]  }
  0x11   :  { %110 = dma.done.wait [#allocation5], 128  }
  0x12   :  { %111 = vsyncadd [#allocation5], 4294967168  ;;  %v27_v0 = vlaneseq  ;;  %s25_s23 = smul.u32 2654435769, %s158_s0  ;;  %v45_v14 = vld [vmem:[#allocation4] sm:$0xff]  ;;  %s115_s1 = smov [#allocation7]  }
  0x13   :  { %v46_v16 = vmul.f32 2.0, %v45_v14  ;;  %s55_s24 = sshll.u32 %s115_s1, 4  ;;  %s56_s24 = int_to_ptr.vmem [resolvable:$true] %s55_s24 }
  0x14   :  { %v28_v1 = vshrl.u32 %v27_v0, 7  ;;  %v30_v2 = vand.u32 127, %v27_v0  ;;  %v33_v4 = vstv %s25_s23  ;;  %s88_s0 = scalar_lea.vmem %s56_s24, 128  ;;  %p93_p9 = scmp.lt.s32.totalorder %s56_s24, %s56_s24 }
  0x15   :  { %p89_p8 = scmp.ne.s32.totalorder %s56_s24, %s88_s0  ;;  %p94_p10 = scmp.lt.s32.totalorder %s88_s0, %s88_s0 }
  0x16   :  { %v31_v3 = vmul.u32 128, %v28_v1 }
  0x17   :  { %p95_p11 = por %p94_p10, %p93_p9 }
  0x18   :  { %v32_v5 = vadd.s32 %v31_v3, %v30_v2 }
  0x19   :  { %p96_p12 = pnand %p95_p11, %p89_p8 }
  0x1a   :  { %v34_v6 = vadd.s32 %v33_v4, %v32_v5 }
  0x1c   :  { %v35_v7 = vshrl.u32 %v34_v6, 16 }
  0x1e   :  { %v36_v8 = vxor.u32 %v35_v7, %v34_v6 }
  0x20   :  { %v37_v9 = vmul.u32 2146121005, %v36_v8 }
  0x22   :  { %v38_v10 = vshrl.u32 %v37_v9, 15 }
  0x24   :  { %v39_v11 = vxor.u32 %v38_v10, %v37_v9 }
  0x26   :  { %v40_v12 = vmul.u32 2221713035, %v39_v11 }
  0x28   :  { %v41_v13 = vshrl.u32 %v40_v12, 16 }
  0x2a   :  { %v42_v15 = vxor.u32 %v41_v13, %v40_v12 }
  0x2c   :  { %v43_v17 = vshrl.u32 %v42_v15, 16 }
  0x2e   :  { %vm44_vm0 = vcmp.ge.u32.totalorder %v43_v17, 32768 }
  0x2f   :  { %v47_v18 = vsel %vm44_vm0, %v46_v16, 0.0 }
  0x30   :  { %48 = vst [vmem:[#allocation7] sm:$0xff] %v47_v18 }
  0x31   :  { %99 = shalt.err (!%p96_p12)
}
  0x32   :  { %s100_s27 = scalar_lea.hbm %s160_s2, 128 }
  0x33   :  { %p101_p13 = scmp.ne.s32.totalorder %s160_s2, %s100_s27  ;;  %p104_p0 = scmp.lt.u32.totalorder %s100_s27, %s160_s2 }
  0x35   :  { %p106_p1 = pnand %p104_p0, %p101_p13 }
  0x37   :  { %109 = shalt.err (!%p106_p1)
}
  0x38   :  { %58 = dma.vmem_to_hbm [thread:$0]  %s56_s24, 128, %s160_s2, [#allocation6]  }
  0x39   :  { %112 = dma.done.wait [#allocation6], 128  }
  0x3a   :  { %113 = vsyncadd [#allocation6], 4294967168 }
  0x3b   :  { %62 = vsyncpa [#allocation5], 1 }
  0x3c   :  { %63 = vsyncpa [#allocation6], 1 }

</bundles_post_ra>
